<compile_context>
chip_gen: v5e
topology: v5e:2x2
jax: 0.10.0
libtpu: 0.0.40
codegen_flags: <defaults>
</compile_context>

<pallas_src>
import jax
import jax.numpy as jnp
from jax import lax
from jax.experimental import pallas as pl
from jax.experimental.pallas import tpu as pltpu


# --------------------------------------------------------------------------- #
# VMEM-aware tiling                                                            #
# --------------------------------------------------------------------------- #
def _vmem_capacity_bytes():
    """Physical VMEM of the current TPU generation (fallback: 64 MiB == v7x)."""
    try:
        cap = getattr(pltpu.get_tpu_info(), "vmem_capacity_bytes", None)
        if cap:
            return int(cap)
    except Exception:  # query unsupported -> most conservative assumption
        pass
    return 64 * 1024 * 1024


def _pick_tn(d_out, d_in, batch, num_classes, vmem_limit):
    """Largest 128-multiple divisor of d_out whose double-buffered working set
    fits ~70% of the VMEM limit.  Bigger W tiles amortize the ~0.35us/step
    pipeline overhead and keep the W DMA at HBM roofline."""
    if d_out % 128 != 0:
        return d_out                          # tiny model: one full-width tile
    budget = int(vmem_limit * 0.7)
    best, t = 128, 128
    while t <= min(d_out, 2048):
        if d_out % t == 0:
            need = (
                2 * (batch * d_in * 2)            # x (bf16, constant index map)
                + 2 * (d_in * t * 2)              # W^T column tile (bf16), 2 buffers
                + 2 * (t * num_classes * 2)       # v^T row tile (bf16)
                + 2 * (t * 4)                     # bias tile (f32)
                + 2 * (batch * t * 4)             # y output tile (f32)
                + 2 * (batch * num_classes * 4)   # z partial (f32)
            )
            if need <= budget:
                best = t
        t += 128
    return best


# --------------------------------------------------------------------------- #
# Kernels                                                                      #
# --------------------------------------------------------------------------- #
def _wstream_kernel(x_ref, wt_ref, vt_ref, b_ref, y_ref, z_ref):
    # y_j = x @ W^T[:, tile_j]  -- canonical (M,K)x(K,N) layout, MXU, f32 acc.
    y = lax.dot_general(x_ref[...], wt_ref[...],
                        (((1,), (0,)), ((), ())),
                        preferred_element_type=jnp.float32)               # (B, tn)
    y_ref[...] = (y + b_ref[...]).astype(y_ref.dtype)
    # per-tile partial of z = (x @ W^T) @ v^T; summed in the epilogue.
    z_ref[0, :, :] = lax.dot_general(y.astype(jnp.bfloat16), vt_ref[...],
                                     (((1,), (0,)), ((), ())),
                                     preferred_element_type=jnp.float32)  # (B, C)


def _epilogue_kernel(y_ref, z_ref, a_ref, o_ref):
    # out = (y + b) + (sum_j z_j) @ A     -- tiny; everything VMEM resident.
    z = jnp.sum(z_ref[...], axis=0)                                       # (B, C)
    corr = lax.dot_general(z.astype(jnp.bfloat16), a_ref[...],
                           (((1,), (0,)), ((), ())),
                           preferred_element_type=jnp.float32)            # (B, D)
    o_ref[...] = (y_ref[...] + corr).astype(o_ref.dtype)


# --------------------------------------------------------------------------- #
# Wrapper                                                                      #
# --------------------------------------------------------------------------- #
def prepare_route_linear_params(w, v):
    """One-time (weight-load time) preprocessing: pre-transpose + bf16-cast the
    weights the main kernel streams, so no per-tile relayout of the D^2 operand
    and no per-forward transpose traffic."""
    wt = jnp.asarray(w).T.astype(jnp.bfloat16)       # (d_in, d_out) == W^T
    vt = jnp.asarray(v).T.astype(jnp.bfloat16)       # (d_out, C)    == v^T
    return wt, vt


def route_linear(x, w_att, b_att, u, b, wt, vt):
    """RouteLinear forward.
    x:(B,D) w_att:(C,D) b_att:(C,) u:(C,D) b:(D,) wt:(D,D)=W^T vt:(D,C)=v^T -> (B,D)."""
    B, d_in = x.shape
    d_in2, d_out = wt.shape
    C = u.shape[0]
    # The reference forward is only shape-valid under these constraints.
    assert d_in == d_in2 and d_in == d_out, "RouteLinear requires in_features == out_features"
    assert B == C, "RouteLinear forward requires batch == num_classes"
    assert w_att.shape == (C, d_in) and u.shape == (C, d_in) and vt.shape == (d_out, C)

    f32, bf16 = jnp.float32, jnp.bfloat16

    # ---- prologue (O(B*C*D), tiny): plain XLA per review; A emitted bf16. ----
    att = jax.nn.sigmoid(x.astype(f32) @ w_att.astype(f32).T + b_att.astype(f32))   # (B, C)
    a_bf = (att @ u.astype(f32)).astype(bf16)                                        # (B, D)

    # ---- main kernel: stream W^T column tiles from HBM exactly once. ---------
    vmem_limit = (_vmem_capacity_bytes() * 3) // 4      # ~96 MiB v5e/v6e, ~48 MiB v7x
    tn = _pick_tn(d_out, d_in, B, C, vmem_limit)
    nj = d_out // tn

    xb = x.astype(bf16)
    b2 = b.reshape(1, d_out).astype(f32)

    flops = 2 * B * d_in * d_out + 2 * B * d_out * C
    bytes_accessed = (2 * (B * d_in + d_in * d_out + d_out * C)     # bf16 inputs, W read ONCE
                      + 4 * d_out                                   # bias
                      + 4 * B * d_out + 4 * nj * B * C)             # y + z-partial outputs

    y_biased, z_parts = pl.pallas_call(
        _wstream_kernel,
        out_shape=(jax.ShapeDtypeStruct((B, d_out), f32),
                   jax.ShapeDtypeStruct((nj, B, C), f32)),
        grid=(nj,),
        in_specs=[
            pl.BlockSpec((B, d_in), lambda j: (0, 0)),     # x        (VMEM resident)
            pl.BlockSpec((d_in, tn), lambda j: (0, j)),    # W^T tile (the D^2 stream)
            pl.BlockSpec((tn, C), lambda j: (j, 0)),       # v^T tile
            pl.BlockSpec((1, tn), lambda j: (0, j)),       # bias tile
        ],
        out_specs=(pl.BlockSpec((B, tn), lambda j: (0, j)),        # y_j + b_j (disjoint cols)
                   pl.BlockSpec((1, B, C), lambda j: (j, 0, 0))),  # z partial per tile
        compiler_params=pltpu.CompilerParams(
            # Disjoint outputs per j -> a real parallel axis for v7x's 2 TCs.
            dimension_semantics=("parallel",),
            vmem_limit_bytes=int(vmem_limit),
        ),
        cost_estimate=pl.CostEstimate(flops=int(flops), transcendentals=0,
                                      bytes_accessed=int(bytes_accessed)),
    )(xb, wt, vt, b2)

    # ---- epilogue (tiny): out = y + b + (sum_j z_j) @ A. ---------------------
    out = pl.pallas_call(
        _epilogue_kernel,
        out_shape=jax.ShapeDtypeStruct((B, d_out), x.dtype),
        in_specs=[pl.BlockSpec(memory_space=pltpu.MemorySpace.VMEM)] * 3,
        out_specs=pl.BlockSpec(memory_space=pltpu.MemorySpace.VMEM),
    )(y_biased, z_parts, a_bf)
    return out


# --------------------------------------------------------------------------- #
# Self-test                                                                    #
# --------------------------------------------------------------------------- #
if __name__ == "__main__":
    B = 8      # batch (must equal num_classes -- see module semantics)
    C = 8      # num_classes
    D = 128    # in_features == out_features

    key = jax.random.PRNGKey(0)
    ks = jax.random.split(key, 7)
    x     = jax.random.normal(ks[0], (B, D), jnp.float32)
    w     = jax.random.normal(ks[1], (D, D), jnp.float32) * 0.05   # linear.weight
    b     = jax.random.normal(ks[2], (D,),   jnp.float32) * 0.05   # linear.bias
    u     = jax.random.normal(ks[3], (C, D), jnp.float32)          # self.u
    v     = jax.random.normal(ks[4], (C, D), jnp.float32)          # self.v
    w_att = jax.random.normal(ks[5], (C, D), jnp.float32) * 0.05   # attention_route.weight
    b_att = jax.random.normal(ks[6], (C,),   jnp.float32) * 0.05   # attention_route.bias

    wt, vt = prepare_route_linear_params(w, v)     # once, at weight-load time
    fwd = jax.jit(route_linear)
    out = jax.block_until_ready(fwd(x, w_att, b_att, u, b, wt, vt))

    # Pure f32 JAX reference (kernel feeds the MXU bf16 operands, f32 accumulation).
    att_ref = jax.nn.sigmoid(x @ w_att.T + b_att)
    lora_ref = (att_ref @ u).T @ (v @ w)
    ref = x @ (lora_ref + w).T + b
    assert out.shape == (B, D) and out.dtype == x.dtype
    rel_err = float(jnp.max(jnp.abs(out - ref)) / jnp.max(jnp.abs(ref)))
    assert rel_err < 3e-2, f"kernel/ref mismatch: rel_err={rel_err}"

    print("KERNEL_OK")
</pallas_src>

<mosaic_0001>
module attributes {stable_mosaic.version = 11 : i64} {
  func.func @_wstream_kernel(%arg0: i32, %arg1: memref<8x128xbf16, #tpu.memory_space<vmem>>, %arg2: memref<128x128xbf16, #tpu.memory_space<vmem>>, %arg3: memref<128x8xbf16, #tpu.memory_space<vmem>>, %arg4: memref<1x128xf32, #tpu.memory_space<vmem>>, %arg5: memref<8x128xf32, #tpu.memory_space<vmem>>, %arg6: memref<1x8x8xf32, #tpu.memory_space<vmem>>) attributes {dimension_semantics = [#tpu.dimension_semantics<parallel>], iteration_bounds = array<i64: 1>, scalar_prefetch = 0 : i64, scratch_operands = 0 : i64, tpu.core_type = #tpu.core_type<tc>, window_params = [{pipeline_mode = #tpu.pipeline_mode<synchronous>, transform_indices = @transform_0, window_bounds = array<i64: 8, 128>}, {transform_indices = @transform_1, window_bounds = array<i64: 128, 128>}, {transform_indices = @transform_2, window_bounds = array<i64: 128, 8>}, {transform_indices = @transform_3, window_bounds = array<i64: 1, 128>}, {transform_indices = @transform_4, window_bounds = array<i64: 8, 128>}, {transform_indices = @transform_5, window_bounds = array<i64: 1, 8, 8>}]} {
    %c0 = arith.constant 0 : index
    %c0_0 = arith.constant 0 : index
    %0 = vector.load %arg1[%c0, %c0_0] : memref<8x128xbf16, #tpu.memory_space<vmem>>, vector<8x128xbf16>
    %c0_1 = arith.constant 0 : index
    %c0_2 = arith.constant 0 : index
    %1 = vector.load %arg2[%c0_1, %c0_2] : memref<128x128xbf16, #tpu.memory_space<vmem>>, vector<128x128xbf16>
    %cst = arith.constant dense<0.000000e+00> : vector<8x128xf32>
    %2 = tpu.matmul %0, %1, %cst {dimension_numbers = #tpu.dot_dimension_numbers<[1], [0], [0], [1], [0, 0, 1, 1], [], []>} : vector<8x128xbf16>, vector<128x128xbf16>, vector<8x128xf32> -> vector<8x128xf32>
    %c0_3 = arith.constant 0 : index
    %c0_4 = arith.constant 0 : index
    %3 = vector.load %arg4[%c0_3, %c0_4] : memref<1x128xf32, #tpu.memory_space<vmem>>, vector<1x128xf32>
    %4 = vector.broadcast %3 : vector<1x128xf32> to vector<8x128xf32>
    %5 = arith.addf %2, %4 : vector<8x128xf32>
    %c0_5 = arith.constant 0 : index
    %c0_6 = arith.constant 0 : index
    %6 = vector.load %arg5[%c0_5, %c0_6] : memref<8x128xf32, #tpu.memory_space<vmem>>, vector<8x128xf32>
    tpu.vector_store %arg5[%c0_5, %c0_6], %5 {strides = array<i32>} : memref<8x128xf32, #tpu.memory_space<vmem>>, vector<8x128xf32>,
    %7 = arith.truncf %2 : vector<8x128xf32> to vector<8x128xbf16>
    %c0_7 = arith.constant 0 : index
    %c0_8 = arith.constant 0 : index
    %8 = vector.load %arg3[%c0_7, %c0_8] : memref<128x8xbf16, #tpu.memory_space<vmem>>, vector<128x8xbf16>
    %cst_9 = arith.constant dense<0.000000e+00> : vector<8x8xf32>
    %9 = tpu.matmul %7, %8, %cst_9 {dimension_numbers = #tpu.dot_dimension_numbers<[1], [0], [0], [1], [0, 0, 1, 1], [], []>} : vector<8x128xbf16>, vector<128x8xbf16>, vector<8x8xf32> -> vector<8x8xf32>
    %c0_10 = arith.constant 0 : index
    %c0_11 = arith.constant 0 : index
    %c0_12 = arith.constant 0 : index
    %10 = vector.load %arg6[%c0_10, %c0_11, %c0_12] : memref<1x8x8xf32, #tpu.memory_space<vmem>>, vector<1x8x8xf32>
    %11 = vector.shape_cast %10 : vector<1x8x8xf32> to vector<8x8xf32>
    %12 = vector.shape_cast %9 : vector<8x8xf32> to vector<1x8x8xf32>
    tpu.vector_store %arg6[%c0_10, %c0_11, %c0_12], %12 {strides = array<i32>} : memref<1x8x8xf32, #tpu.memory_space<vmem>>, vector<1x8x8xf32>,
    return
  }
  func.func @transform_0(%arg0: i32) -> (i32, i32) {
    %c0_i32 = arith.constant 0 : i32
    %c0_i32_0 = arith.constant 0 : i32
    %c0_i32_1 = arith.constant 0 : i32
    return %c0_i32, %c0_i32_0 : i32, i32
  }
  func.func @transform_1(%arg0: i32) -> (i32, i32) {
    %c0_i32 = arith.constant 0 : i32
    %c0_i32_0 = arith.constant 0 : i32
    return %c0_i32, %arg0 : i32, i32
  }
  func.func @transform_2(%arg0: i32) -> (i32, i32) {
    %c0_i32 = arith.constant 0 : i32
    %c0_i32_0 = arith.constant 0 : i32
    return %arg0, %c0_i32 : i32, i32
  }
  func.func @transform_3(%arg0: i32) -> (i32, i32) {
    %c0_i32 = arith.constant 0 : i32
    %c0_i32_0 = arith.constant 0 : i32
    return %c0_i32, %arg0 : i32, i32
  }
  func.func @transform_4(%arg0: i32) -> (i32, i32) {
    %c0_i32 = arith.constant 0 : i32
    %c0_i32_0 = arith.constant 0 : i32
    return %c0_i32, %arg0 : i32, i32
  }
  func.func @transform_5(%arg0: i32) -> (i32, i32, i32) {
    %c0_i32 = arith.constant 0 : i32
    %c0_i32_0 = arith.constant 0 : i32
    %c0_i32_1 = arith.constant 0 : i32
    return %arg0, %c0_i32, %c0_i32_0 : i32, i32, i32
  }
}

module attributes {stable_mosaic.version = 11 : i64} {
  func.func @_epilogue_kernel(%arg0: memref<8x128xf32, #tpu.memory_space<vmem>>, %arg1: memref<1x8x8xf32, #tpu.memory_space<vmem>>, %arg2: memref<8x128xbf16, #tpu.memory_space<vmem>>, %arg3: memref<8x128xf32, #tpu.memory_space<vmem>>) attributes {dimension_semantics = [], scalar_prefetch = 0 : i64, scratch_operands = 0 : i64, tpu.core_type = #tpu.core_type<tc>} {
    %c0 = arith.constant 0 : index
    %c0_0 = arith.constant 0 : index
    %c0_1 = arith.constant 0 : index
    %0 = vector.load %arg1[%c0, %c0_0, %c0_1] : memref<1x8x8xf32, #tpu.memory_space<vmem>>, vector<1x8x8xf32>
    %cst = arith.constant dense<0.000000e+00> : vector<8x8xf32>
    %1 = vector.multi_reduction <add>, %0, %cst [0] : vector<1x8x8xf32> to vector<8x8xf32>
    %2 = arith.truncf %1 : vector<8x8xf32> to vector<8x8xbf16>
    %c0_2 = arith.constant 0 : index
    %c0_3 = arith.constant 0 : index
    %3 = vector.load %arg2[%c0_2, %c0_3] : memref<8x128xbf16, #tpu.memory_space<vmem>>, vector<8x128xbf16>
    %cst_4 = arith.constant dense<0.000000e+00> : vector<8x128xf32>
    %4 = tpu.matmul %2, %3, %cst_4 {dimension_numbers = #tpu.dot_dimension_numbers<[1], [0], [0], [1], [0, 0, 1, 1], [], []>} : vector<8x8xbf16>, vector<8x128xbf16>, vector<8x128xf32> -> vector<8x128xf32>
    %c0_5 = arith.constant 0 : index
    %c0_6 = arith.constant 0 : index
    %5 = vector.load %arg0[%c0_5, %c0_6] : memref<8x128xf32, #tpu.memory_space<vmem>>, vector<8x128xf32>
    %6 = arith.addf %5, %4 : vector<8x128xf32>
    %c0_7 = arith.constant 0 : index
    %c0_8 = arith.constant 0 : index
    %7 = vector.load %arg3[%c0_7, %c0_8] : memref<8x128xf32, #tpu.memory_space<vmem>>, vector<8x128xf32>
    tpu.vector_store %arg3[%c0_7, %c0_8], %6 {strides = array<i32>} : memref<8x128xf32, #tpu.memory_space<vmem>>, vector<8x128xf32>,
    return
  }
}

</mosaic_0001>

<bundles_post_ra>
// kernel: route_linear.3
= control target key start
LH: loop header
LB: loop body
LE: loop exit
PB: predicated region body
PF: predicated region fallthrough
CT: control target
= control target key end

     0   :  { %vm24_vm0 = vcmask 1043456   ;;  %s121_s0 = inlined_call_operand.vmem [shape: f32[8,128], index: 0, kind: input, shape index: {}]   ;;  %s122_s1 = inlined_call_operand.vmem [shape: f32[1,8,8], index: 1, kind: input, shape index: {}]   ;;  %s123_s2 = inlined_call_operand.vmem [shape: bf16[8,128], index: 2, kind: input, shape index: {}]   ;;  %s124_s3 = inlined_call_operand.hbm [shape: f32[8,128], index: 3, kind: output, shape index: {}]  }
   0x1   :  { %v19_v0 = vld [vmem:[%s123_s2] sm:$0xf] }
   0x2   :  { %v16_v1 = vld [vmem:[%s122_s1] sm:$0xff]  ;;  %v26_v2 = vsel %vm24_vm0, %v19_v0, 0 }
   0x3   :  { %v18_v3 = vpack.c.bf16 %v16_v1, %v16_v1 }
   0x4   :  { %8 = vsyncpa [#allocation3], 0  ;;  %35 = vmatpush.bf16.msra.mxu0 %v26_v2  ;;  %vm20_vm1 = vcmask 64512   ;;  %v41_v4 = vld [vmem:[%s121_s0] sm:$0xff]  ;;  %s88_s18 = smov [#allocation2]   ;;  %s51_s2 = sshll.u32 %s124_s3, 4  ;;  %s52_s2 = int_to_ptr.hbm [resolvable:$true] %s51_s2 }
   0x5   :  { %s49_s19 = sshll.u32 %s88_s18, 4  ;;  %s50_s19 = int_to_ptr.vmem [resolvable:$true] %s49_s19 }
   0x7   :  { %60 = vmatmul.msk.bf16.vlgmr.msra.gmra.mxu0 %vm20_vm1, %v18_v3 }
  0x84   :  { %v37_v5 = vpop.f32.mrf.mxu0 }
  0x85   :  { %v42_v6 = vadd.f32 %v41_v4, %v37_v5 }
  0x87   :  { %43 = vst [vmem:[#allocation2] sm:$0xff] %v42_v6 }
  0x88   :  { %54 = dma.vmem_to_hbm [thread:$0]  %s50_s19, 128, %s52_s2, [#allocation3]  }
  0x8c   :  { %v39_v7 = vpop.f32.mrf.mxu0 }
  0x8d   :  { %86 = dma.done.wait [#allocation3], 128  }
  0x8e   :  { %87 = vsyncadd [#allocation3], 4294967168 }
  0x8f   :  { %59 = vsyncpa [#allocation3], 1 }

// kernel: route_linear.2
= control target key start
LH: loop header
LB: loop body
LE: loop exit
PB: predicated region body
PF: predicated region fallthrough
CT: control target
= control target key end

     0   :  { %vm181_vm0 = vcmask 64512   ;;  %s362_s1 = inlined_call_operand.vmem [shape: bf16[128,128], index: 1, kind: input, shape index: {}]   ;;  %s363_s2 = inlined_call_operand.vmem [shape: bf16[128,8], index: 2, kind: input, shape index: {}]   ;;  %s364_s3 = inlined_call_operand.vmem [shape: f32[1,128], index: 3, kind: input, shape index: {}]   ;;  %s365_s0 = inlined_call_operand.vmem [shape: bf16[8,128], index: 0, kind: input, shape index: {}]   ;;  %s366_s4 = inlined_call_operand.vmem [shape: f32[8,128], index: 4, kind: output, shape index: {0}]   ;;  %s367_s5 = inlined_call_operand.vmem [shape: f32[1,8,8], index: 5, kind: output, shape index: {1}]  }
   0x1   :  { %v262_v0 = vld [vmem:[%s362_s1 + $0x38] sm:$0xff]  ;;  %v261_v1 = vld [vmem:[%s362_s1 + $0x30] sm:$0xff]  ;;  %v260_v4 = vld [vmem:[%s362_s1 + $0x28] sm:$0xff] }
   0x2   :  { %84 = vmatpush.bf16.msra.mxu0 %v262_v0  ;;  %v270_v2 = vld [vmem:[%s363_s2 + $0x38] sm:$0xff]  ;;  %v269_v3 = vld [vmem:[%s363_s2 + $0x30] sm:$0xff]  ;;  %v268_v5 = vld [vmem:[%s363_s2 + $0x28] sm:$0xff] }
   0x3   :  { %168 = vmatpush.bf16.msra.mxu1 %v270_v2  ;;  %v259_v6 = vld [vmem:[%s362_s1 + $0x20] sm:$0xff]  ;;  %v258_v8 = vld [vmem:[%s362_s1 + $0x18] sm:$0xff]  ;;  %v257_v10 = vld [vmem:[%s362_s1 + $0x10] sm:$0xff] }
   0x4   :  { %v267_v7 = vld [vmem:[%s363_s2 + $0x20] sm:$0xff]  ;;  %v266_v9 = vld [vmem:[%s363_s2 + $0x18] sm:$0xff]  ;;  %v265_v11 = vld [vmem:[%s363_s2 + $0x10] sm:$0xff] }
   0x5   :  { %v256_v12 = vld [vmem:[%s362_s1 + $0x8] sm:$0xff]  ;;  %v255_v14 = vld [vmem:[%s362_s1] sm:$0xff] }
   0x6   :  { %85 = vmatpush.bf16.msra.mxu0 %v261_v1  ;;  %v264_v13 = vld [vmem:[%s363_s2 + $0x8] sm:$0xff]  ;;  %v19_v15 = vld [vmem:[%s365_s0] sm:$0xf] }
   0x7   :  { %169 = vmatpush.bf16.msra.mxu1 %v269_v3  ;;  %v263_v16 = vld [vmem:[%s363_s2] sm:$0xff] }
   0x8   :  { %v271_v17 = vld [vmem:[%s364_s3] ss:$0 sm:$0xff] }
   0xa   :  { %86 = vmatpush.bf16.msra.mxu0 %v260_v4 }
   0xb   :  { %170 = vmatpush.bf16.msra.mxu1 %v268_v5 }
   0xe   :  { %87 = vmatpush.bf16.msra.mxu0 %v259_v6 }
   0xf   :  { %171 = vmatpush.bf16.msra.mxu1 %v267_v7 }
  0x12   :  { %88 = vmatpush.bf16.msra.mxu0 %v258_v8 }
  0x13   :  { %172 = vmatpush.bf16.msra.mxu1 %v266_v9 }
  0x16   :  { %89 = vmatpush.bf16.msra.mxu0 %v257_v10 }
  0x17   :  { %173 = vmatpush.bf16.msra.mxu1 %v265_v11 }
  0x1a   :  { %90 = vmatpush.bf16.msra.mxu0 %v256_v12 }
  0x1b   :  { %174 = vmatpush.bf16.msra.mxu1 %v264_v13 }
  0x1e   :  { %91 = vmatpush.bf16.msra.mxu0 %v255_v14 }
  0x1f   :  { %175 = vmatpush.bf16.msra.mxu1 %v263_v16 }
  0x21   :  { %92 = vmatmul.bf16.vlgmr.msra.gmra.mxu0 %v19_v15 }
  0x9e   :  { %v93_v18 = vpop.f32.mrf.mxu0 }
  0x9f   :  { %v101_v19 = vadd.f32 %v271_v17, %v93_v18  ;;  %v103_v20 = vpack.c.bf16 %v93_v18, %v93_v18 }
  0xa1   :  { %102 = vst [vmem:[%s366_s4] sm:$0xff] %v101_v19  ;;  %176 = vmatmul.bf16.vlgmr.msra.gmra.mxu1 %v103_v20 }
  0xa6   :  { %v95_v21 = vpop.f32.mrf.mxu0 }
 0x11e   :  { %v177_v22 = vpop.f32.mrf.mxu1 }
 0x11f   :  { %182 = vst.msk [vmem:[%s367_s5] sm:$0xff] %vm181_vm0, %v177_v22 }
 0x126   :  { %v179_v23 = vpop.f32.mrf.mxu1 }

</bundles_post_ra>
